<compile_context>
chip_gen: v7x
topology: tpu7x:2x2x1
jax: 0.10.0
libtpu: 0.0.40
codegen_flags: <defaults>
</compile_context>

<pallas_src>
import jax
import jax.numpy as jnp
from jax.experimental import pallas as pl
from jax.experimental.pallas import tpu as pltpu

_LANES = 128
_SUBLANES = 8


# ----------------------------------------------------------------------------
# Kernel: fused masked-MSE reduction over row tiles
# ----------------------------------------------------------------------------
def _masked_mse_kernel(pred_ref, true_ref, loss_ref, sq_acc, cnt_acc):
    step = pl.program_id(0)

    @pl.when(step == 0)
    def _init():
        sq_acc[...] = jnp.zeros_like(sq_acc)
        cnt_acc[...] = jnp.zeros_like(cnt_acc)

    t = true_ref[...]                                  # [TM, 128] f32
    p = pred_ref[...]                                  # [TM, 128] f32
    mask = (t != -1.0).astype(jnp.float32)             # exact sentinel compare
    diff = (t - p) * mask
    sq = diff * diff

    # Fold the (TM, 128) tile into vreg-shaped (8, 128) partial sums with pure
    # VPU adds over the leading axis (no cross-lane reduction per step).
    tm = sq.shape[0]
    sq_acc[...] += jnp.sum(sq.reshape(tm // _SUBLANES, _SUBLANES, _LANES), axis=0)
    cnt_acc[...] += jnp.sum(mask.reshape(tm // _SUBLANES, _SUBLANES, _LANES), axis=0)

    @pl.when(step == pl.num_programs(0) - 1)
    def _finalize():
        # mean over selected elements == masked-sum / count
        # (0/0 -> nan matches torch's mean over an empty selection)
        total_sq = jnp.sum(sq_acc[...])
        total_cnt = jnp.sum(cnt_acc[...])
        loss_ref[...] = (total_sq / total_cnt).reshape(1, 1)


# ----------------------------------------------------------------------------
# Wrapper: lane-dense repack + single gridded pallas_call
# ----------------------------------------------------------------------------
def masked_mse_loss(pred, true, *, row_tile=1024):
    pred = jnp.asarray(pred, jnp.float32).reshape(-1)
    true = jnp.asarray(true, jnp.float32).reshape(-1)
    n = pred.shape[0]

    # Repack to [rows, 128]; pad `true` with -1 so padded slots are masked out.
    rows_needed = -(-n // _LANES)
    rows_aligned = max(_SUBLANES, -(-rows_needed // _SUBLANES) * _SUBLANES)
    tm = min(row_tile, rows_aligned)                     # multiple of 8
    rows_total = -(-rows_aligned // tm) * tm             # multiple of tm
    pad = rows_total * _LANES - n

    if pad:
        pred2 = jnp.pad(pred, (0, pad)).reshape(rows_total, _LANES)
        true2 = jnp.pad(true, (0, pad), constant_values=-1.0).reshape(rows_total, _LANES)
    else:  # reshape is free when no padding is required
        pred2 = pred.reshape(rows_total, _LANES)
        true2 = true.reshape(rows_total, _LANES)

    loss = pl.pallas_call(
        _masked_mse_kernel,
        out_shape=jax.ShapeDtypeStruct((1, 1), jnp.float32),
        grid_spec=pltpu.PrefetchScalarGridSpec(
            num_scalar_prefetch=0,
            grid=(rows_total // tm,),
            in_specs=[
                pl.BlockSpec((tm, _LANES), lambda i: (i, 0)),
                pl.BlockSpec((tm, _LANES), lambda i: (i, 0)),
            ],
            out_specs=pl.BlockSpec((1, 1), lambda i: (0, 0)),
            scratch_shapes=[
                pltpu.VMEM((_SUBLANES, _LANES), jnp.float32),  # masked sq-error partials
                pltpu.VMEM((_SUBLANES, _LANES), jnp.float32),  # mask-count partials
            ],
        ),
        compiler_params=pltpu.CompilerParams(
            dimension_semantics=("arbitrary",)),   # reduction axis, resident output
    )(pred2, true2)
    return loss[0, 0]


# ----------------------------------------------------------------------------
# Pure-JAX reference for correctness checking
# ----------------------------------------------------------------------------
def _masked_mse_ref(pred, true):
    pred = jnp.asarray(pred, jnp.float32)
    true = jnp.asarray(true, jnp.float32)
    mask = true != -1.0
    diff = jnp.where(mask, true - pred, 0.0)
    return jnp.sum(diff * diff) / jnp.sum(mask.astype(jnp.float32))


if __name__ == "__main__":
    key = jax.random.PRNGKey(0)
    k1, k2, k3, k4, k5, k6 = jax.random.split(key, 6)

    # Case 1: the shape this loss sees in Comments_Prediction — model head output
    #         [n_reg, 1], with -1 marking missing targets.
    n_reg = 8
    pred1 = jax.random.normal(k1, (n_reg, 1), dtype=jnp.float32)
    true1 = jax.random.normal(k2, (n_reg, 1), dtype=jnp.float32)
    true1 = jnp.where(jax.random.bernoulli(k3, 0.3, (n_reg, 1)), -1.0, true1)

    # Case 2: larger, lane-dense input to exercise the multi-step reduction grid.
    pred2 = jax.random.normal(k4, (512, 128), dtype=jnp.float32)
    true2 = jax.random.normal(k5, (512, 128), dtype=jnp.float32)
    true2 = jnp.where(jax.random.bernoulli(k6, 0.25, (512, 128)), -1.0, true2)

    for pred, true in ((pred1, true1), (pred2, true2)):
        loss = jax.block_until_ready(masked_mse_loss(pred, true, row_tile=256))
        ref = jax.block_until_ready(_masked_mse_ref(pred, true))
        assert loss.shape == () and loss.dtype == jnp.float32
        assert jnp.allclose(loss, ref, rtol=1e-5, atol=1e-6), (loss, ref)

    print("KERNEL_OK")
</pallas_src>

<mosaic_0001>
module attributes {stable_mosaic.version = 11 : i64} {
  func.func @_masked_mse_kernel(%arg0: i32, %arg1: memref<8x128xf32, #tpu.memory_space<vmem>>, %arg2: memref<8x128xf32, #tpu.memory_space<vmem>>, %arg3: memref<1x1xf32, #tpu.memory_space<vmem>>, %arg4: memref<8x128xf32, #tpu.memory_space<vmem>>, %arg5: memref<8x128xf32, #tpu.memory_space<vmem>>) attributes {dimension_semantics = [#tpu.dimension_semantics<arbitrary>], iteration_bounds = array<i64: 1>, scalar_prefetch = 0 : i64, scratch_operands = 2 : i64, tpu.core_type = #tpu.core_type<tc>, window_params = [{transform_indices = @transform_0, window_bounds = array<i64: 8, 128>}, {transform_indices = @transform_1, window_bounds = array<i64: 8, 128>}, {pipeline_mode = #tpu.pipeline_mode<synchronous>, transform_indices = @transform_2, window_bounds = array<i64: 1, 1>}]} {
    %c0_i32 = arith.constant 0 : i32
    %0 = arith.cmpi eq, %arg0, %c0_i32 : i32
    %1 = arith.extui %0 : i1 to i32
    %c0_i32_0 = arith.constant 0 : i32
    %2 = arith.cmpi ne, %1, %c0_i32_0 : i32
    scf.if %2 {
      %cst_16 = arith.constant 0.000000e+00 : f32
      %25 = vector.broadcast %cst_16 : f32 to vector<8x128xf32>
      %c0_17 = arith.constant 0 : index
      %c0_18 = arith.constant 0 : index
      %26 = vector.load %arg4[%c0_17, %c0_18] : memref<8x128xf32, #tpu.memory_space<vmem>>, vector<8x128xf32>
      tpu.vector_store %arg4[%c0_17, %c0_18], %25 {strides = array<i32>} : memref<8x128xf32, #tpu.memory_space<vmem>>, vector<8x128xf32>,
      %cst_19 = arith.constant 0.000000e+00 : f32
      %27 = vector.broadcast %cst_19 : f32 to vector<8x128xf32>
      %c0_20 = arith.constant 0 : index
      %c0_21 = arith.constant 0 : index
      %28 = vector.load %arg5[%c0_20, %c0_21] : memref<8x128xf32, #tpu.memory_space<vmem>>, vector<8x128xf32>
      tpu.vector_store %arg5[%c0_20, %c0_21], %27 {strides = array<i32>} : memref<8x128xf32, #tpu.memory_space<vmem>>, vector<8x128xf32>,
    } else {
    }
    %c0 = arith.constant 0 : index
    %c0_1 = arith.constant 0 : index
    %3 = vector.load %arg2[%c0, %c0_1] : memref<8x128xf32, #tpu.memory_space<vmem>>, vector<8x128xf32>
    %c0_2 = arith.constant 0 : index
    %c0_3 = arith.constant 0 : index
    %4 = vector.load %arg1[%c0_2, %c0_3] : memref<8x128xf32, #tpu.memory_space<vmem>>, vector<8x128xf32>
    %cst = arith.constant -1.000000e+00 : f32
    %5 = vector.broadcast %cst : f32 to vector<8x128xf32>
    %6 = arith.cmpf one, %3, %5 : vector<8x128xf32>
    %7 = arith.extui %6 : vector<8x128xi1> to vector<8x128xi32>
    %8 = arith.sitofp %7 : vector<8x128xi32> to vector<8x128xf32>
    %9 = arith.subf %3, %4 : vector<8x128xf32>
    %10 = arith.mulf %9, %8 : vector<8x128xf32>
    %11 = arith.mulf %10, %10 : vector<8x128xf32>
    %c0_4 = arith.constant 0 : index
    %c0_5 = arith.constant 0 : index
    %12 = vector.load %arg4[%c0_4, %c0_5] : memref<8x128xf32, #tpu.memory_space<vmem>>, vector<8x128xf32>
    %13 = vector.shape_cast %11 : vector<8x128xf32> to vector<1x8x128xf32>
    %cst_6 = arith.constant dense<0.000000e+00> : vector<8x128xf32>
    %14 = vector.multi_reduction <add>, %13, %cst_6 [0] : vector<1x8x128xf32> to vector<8x128xf32>
    %15 = arith.addf %12, %14 : vector<8x128xf32>
    %c0_7 = arith.constant 0 : index
    %c0_8 = arith.constant 0 : index
    %16 = vector.load %arg4[%c0_7, %c0_8] : memref<8x128xf32, #tpu.memory_space<vmem>>, vector<8x128xf32>
    tpu.vector_store %arg4[%c0_7, %c0_8], %15 {strides = array<i32>} : memref<8x128xf32, #tpu.memory_space<vmem>>, vector<8x128xf32>,
    %c0_9 = arith.constant 0 : index
    %c0_10 = arith.constant 0 : index
    %17 = vector.load %arg5[%c0_9, %c0_10] : memref<8x128xf32, #tpu.memory_space<vmem>>, vector<8x128xf32>
    %18 = vector.shape_cast %8 : vector<8x128xf32> to vector<1x8x128xf32>
    %cst_11 = arith.constant dense<0.000000e+00> : vector<8x128xf32>
    %19 = vector.multi_reduction <add>, %18, %cst_11 [0] : vector<1x8x128xf32> to vector<8x128xf32>
    %20 = arith.addf %17, %19 : vector<8x128xf32>
    %c0_12 = arith.constant 0 : index
    %c0_13 = arith.constant 0 : index
    %21 = vector.load %arg5[%c0_12, %c0_13] : memref<8x128xf32, #tpu.memory_space<vmem>>, vector<8x128xf32>
    tpu.vector_store %arg5[%c0_12, %c0_13], %20 {strides = array<i32>} : memref<8x128xf32, #tpu.memory_space<vmem>>, vector<8x128xf32>,
    %c0_i32_14 = arith.constant 0 : i32
    %22 = arith.cmpi eq, %arg0, %c0_i32_14 : i32
    %23 = arith.extui %22 : i1 to i32
    %c0_i32_15 = arith.constant 0 : i32
    %24 = arith.cmpi ne, %23, %c0_i32_15 : i32
    scf.if %24 {
      %c0_16 = arith.constant 0 : index
      %c0_17 = arith.constant 0 : index
      %25 = vector.load %arg4[%c0_16, %c0_17] : memref<8x128xf32, #tpu.memory_space<vmem>>, vector<8x128xf32>
      %26 = vector.shape_cast %25 : vector<8x128xf32> to vector<1x8x128xf32>
      %cst_18 = arith.constant dense<0.000000e+00> : vector<1xf32>
      %27 = vector.multi_reduction <add>, %26, %cst_18 [1, 2] : vector<1x8x128xf32> to vector<1xf32>
      %28 = vector.shape_cast %27 : vector<1xf32> to vector<1x1x1xf32>
      %29 = vector.extract %28[0, 0, 0] : f32 from vector<1x1x1xf32>
      %c0_19 = arith.constant 0 : index
      %c0_20 = arith.constant 0 : index
      %30 = vector.load %arg5[%c0_19, %c0_20] : memref<8x128xf32, #tpu.memory_space<vmem>>, vector<8x128xf32>
      %31 = vector.shape_cast %30 : vector<8x128xf32> to vector<1x8x128xf32>
      %cst_21 = arith.constant dense<0.000000e+00> : vector<1xf32>
      %32 = vector.multi_reduction <add>, %31, %cst_21 [1, 2] : vector<1x8x128xf32> to vector<1xf32>
      %33 = vector.shape_cast %32 : vector<1xf32> to vector<1x1x1xf32>
      %34 = vector.extract %33[0, 0, 0] : f32 from vector<1x1x1xf32>
      %35 = arith.divf %29, %34 : f32
      %36 = vector.broadcast %35 : f32 to vector<1x1xf32>
      %c0_22 = arith.constant 0 : index
      %c0_23 = arith.constant 0 : index
      %37 = vector.load %arg3[%c0_22, %c0_23] : memref<1x1xf32, #tpu.memory_space<vmem>>, vector<1x1xf32>
      tpu.vector_store %arg3[%c0_22, %c0_23], %36 {strides = array<i32>} : memref<1x1xf32, #tpu.memory_space<vmem>>, vector<1x1xf32>,
    } else {
    }
    return
  }
  func.func @transform_0(%arg0: i32) -> (i32, i32) {
    %c0_i32 = arith.constant 0 : i32
    %c0_i32_0 = arith.constant 0 : i32
    return %arg0, %c0_i32 : i32, i32
  }
  func.func @transform_1(%arg0: i32) -> (i32, i32) {
    %c0_i32 = arith.constant 0 : i32
    %c0_i32_0 = arith.constant 0 : i32
    return %arg0, %c0_i32 : i32, i32
  }
  func.func @transform_2(%arg0: i32) -> (i32, i32) {
    %c0_i32 = arith.constant 0 : i32
    %c0_i32_0 = arith.constant 0 : i32
    %c0_i32_1 = arith.constant 0 : i32
    return %c0_i32, %c0_i32_0 : i32, i32
  }
}

</mosaic_0001>

<bundles_post_ra>
// kernel: tpu_custom_call.1
= control target key start
LH: loop header
LB: loop body
LE: loop exit
PB: predicated region body
PF: predicated region fallthrough
CT: control target
= control target key end

     0   :  { %7 = vsyncpa [#allocation5], 0  ;;  %s244_s0 = inlined_call_operand.hbm [shape: f32[8,128], index: 0, kind: input, shape index: {}]   ;;  %s245_s1 = inlined_call_operand.hbm [shape: f32[8,128], index: 1, kind: input, shape index: {}]   ;;  %s246_s2 = inlined_call_operand.hbm [shape: f32[1,1], index: 2, kind: output, shape index: {}]  }
   0x1   :  { %8 = vsyncpa [#allocation8], 0 }
   0x2   :  { %9 = vsyncpa [#allocation6], 0  ;;  %s189_s9 = smov [#allocation4]   ;;  %s190_s11 = smov [#allocation7]  }
   0x3   :  { %s16_s10 = sshll.u32 %s189_s9, 4  ;;  %s26_s12 = sshll.u32 %s190_s11, 4  ;;  %s17_s10 = int_to_ptr.vmem [resolvable:$true] %s16_s10  ;;  %s27_s12 = int_to_ptr.vmem [resolvable:$true] %s26_s12 }
   0x4   :  { %s117_s15 = scalar_lea.hbm %s244_s0, 128 }
   0x5   :  { %p118_p0 = scmp.ne.s32.totalorder %s244_s0, %s117_s15  ;;  %p121_p1 = scmp.lt.u32.totalorder %s117_s15, %s244_s0 }
   0x7   :  { %p123_p2 = pnand %p121_p1, %p118_p0 }
   0x9   :  { %126 = shalt.err (!%p123_p2)
}
   0xa   :  { %s127_s20 = scalar_lea.vmem %s17_s10, 128  ;;  %p132_p4 = scmp.lt.s32.totalorder %s17_s10, %s17_s10 }
   0xb   :  { %p128_p3 = scmp.ne.s32.totalorder %s17_s10, %s127_s20  ;;  %p133_p5 = scmp.lt.s32.totalorder %s127_s20, %s127_s20 }
   0xd   :  { %p134_p6 = por %p133_p5, %p132_p4 }
   0xf   :  { %p135_p7 = pnand %p134_p6, %p128_p3 }
  0x11   :  { %138 = shalt.err (!%p135_p7)
}
  0x12   :  { %19 = dma.hbm_to_vmem [thread:$0]  %s244_s0, 128, %s17_s10, [#allocation5]  }
  0x13   :  { %s139_s25 = scalar_lea.hbm %s245_s1, 128 }
  0x14   :  { %p140_p8 = scmp.ne.s32.totalorder %s245_s1, %s139_s25  ;;  %p143_p9 = scmp.lt.u32.totalorder %s139_s25, %s245_s1 }
  0x16   :  { %p145_p10 = pnand %p143_p9, %p140_p8 }
  0x18   :  { %148 = shalt.err (!%p145_p10)
}
  0x19   :  { %s149_s30 = scalar_lea.vmem %s27_s12, 128  ;;  %p154_p12 = scmp.lt.s32.totalorder %s27_s12, %s27_s12 }
  0x1a   :  { %p150_p11 = scmp.ne.s32.totalorder %s27_s12, %s149_s30  ;;  %p155_p13 = scmp.lt.s32.totalorder %s149_s30, %s149_s30 }
  0x1c   :  { %p156_p0 = por %p155_p13, %p154_p12 }
  0x1e   :  { %p157_p1 = pnand %p156_p0, %p150_p11 }
  0x20   :  { %160 = shalt.err (!%p157_p1)
}
  0x21   :  { %29 = dma.hbm_to_vmem [thread:$0]  %s245_s1, 128, %s27_s12, [#allocation8]  }
  0x22   :  { %183 = dma.done.wait [#allocation5], 128  }
  0x23   :  { %184 = vsyncadd [#allocation5], 4294967168 }
  0x24   :  { %185 = dma.done.wait [#allocation8], 128  }
  0x25   :  { %186 = vsyncadd [#allocation8], 4294967168  ;;  %v42_v0 = vld [vmem:[#allocation7] sm:$0xff]  ;;  %v43_v1 = vld [vmem:[#allocation4] sm:$0xff]  ;;  %v191_v3 = vmov 0.0   ;;  %s192_s5 = smov [#allocation9]  }
  0x26   :  { %vm44_vm0 = vcmp.ne.f32.partialorder %v42_v0, -1.0  ;;  %v47_v2 = vsub.f32 %v42_v0, %v43_v1  ;;  %s94_s6 = sshll.u32 %s192_s5, 4  ;;  %vm86_vm1 = vcmask 0   ;;  %s95_s6 = int_to_ptr.vmem [resolvable:$true] %s94_s6 }
  0x27   :  { %v104_v4 = vsel %vm44_vm0, 1.0, %v191_v3  ;;  %s161_s9 = scalar_lea.vmem %s95_s6, 16  ;;  %s165_s10 = scalar_lea.vmem %s95_s6, 32 }
  0x28   :  { %v48_v5 = vmul.f32 %v104_v4, %v47_v2  ;;  %p162_p2 = scmp.ne.s32.totalorder %s95_s6, %s161_s9  ;;  %p166_p3 = scmp.lt.s32.totalorder %s95_s6, %s95_s6 }
  0x29   :  { %p167_p4 = scmp.lt.s32.totalorder %s165_s10, %s161_s9 }
  0x2a   :  { %v49_v6 = vmul.f32 %v48_v5, %v48_v5 }
  0x2b   :  { %p168_p5 = por %p167_p4, %p166_p3 }
  0x2c   :  { %62 = vadd.xlane.f32.xlu0 %v49_v6 }
  0x2d   :  { %p169_p6 = pnand %p168_p5, %p162_p2 }
  0x30   :  { %72 = vadd.xlane.f32.xlu0 %v104_v4 }
  0xb9   :  { %v63_v7 = vpop.xlane.xlu0 %62 }
  0xba   :  { %v64_v8 = vrot.slane %v63_v7, 4 }
  0xbc   :  { %v65_v9 = vadd.f32 %v64_v8, %v63_v7 }
  0xbd   :  { %v73_v10 = vpop.xlane.xlu0 %72 }
  0xbe   :  { %v66_v11 = vrot.slane %v65_v9, 2  ;;  %v74_v12 = vrot.slane %v73_v10, 4 }
  0xc0   :  { %v75_v13 = vadd.f32 %v74_v12, %v73_v10  ;;  %v67_v14 = vadd.f32 %v66_v11, %v65_v9 }
  0xc2   :  { %v76_v15 = vrot.slane %v75_v13, 2  ;;  %v68_v16 = vrot.slane %v67_v14, 1 }
  0xc4   :  { %v77_v17 = vadd.f32 %v76_v15, %v75_v13  ;;  %v69_v18 = vadd.f32 %v68_v16, %v67_v14 }
  0xc6   :  { %105 = vpush %v69_v18  ;;  %v78_v19 = vrot.slane %v77_v17, 1 }
  0xc8   :  { %v79_v20 = vadd.f32 %v78_v19, %v77_v17 }
  0xca   :  { %107 = vpush %v79_v20 }
  0xf7   :  { %s106_s1 = spop %105 }
  0xfb   :  { %s108_s4 = spop %107 }
  0xfc   :  { %v81_v21 = vstv %s108_s4 }
  0xfd   :  { %115 = vrcp.f32 %v81_v21 }
 0x107   :  { %v116_v22 = vpop.eup %115 }
 0x108   :  { %109 = vpush %v116_v22 }
 0x139   :  { %s110_s7 = spop %109 }
 0x13a   :  { %s84_s8 = smul.f32 %s110_s7, %s106_s1 }
 0x13c   :  { %v85_v23 = vstv %s84_s8 }
 0x13d   :  { %87 = vst.msk [vmem:[#allocation9] sm:$0x1] %vm86_vm1, %v85_v23 }
 0x13e   :  { %172 = shalt.err (!%p169_p6)
}
 0x13f   :  { %s173_s13 = scalar_lea.hbm %s246_s2, 16 }
 0x140   :  { %p174_p7 = scmp.ne.s32.totalorder %s246_s2, %s173_s13  ;;  %p177_p8 = scmp.lt.u32.totalorder %s173_s13, %s246_s2 }
 0x142   :  { %p179_p9 = pnand %p177_p8, %p174_p7 }
 0x144   :  { %182 = shalt.err (!%p179_p9)
}
 0x145   :  { %97 = dma.vmem_to_hbm [thread:$0]  %s95_s6, 16, %s246_s2, [#allocation6]  }
 0x146   :  { %187 = dma.done.wait [#allocation6], 16  }
 0x147   :  { %188 = vsyncadd [#allocation6], 4294967280 }
 0x148   :  { %101 = vsyncpa [#allocation5], 1 }
 0x149   :  { %102 = vsyncpa [#allocation8], 1 }
 0x14a   :  { %103 = vsyncpa [#allocation6], 1 }

</bundles_post_ra>
